<compile_context>
chip_gen: v7x
topology: tpu7x:2x2x1
jax: 0.10.0
libtpu: 0.0.40
codegen_flags: <defaults>
</compile_context>

<pallas_src>
import math

import numpy as np
import jax
import jax.numpy as jnp
from jax.experimental import pallas as pl
from jax.experimental.pallas import tpu as pltpu

N_FEATURES = 4
N_HIDDEN = 32
H_PAD = 128          # lane-dense padded hidden width (output / weight lanes)
K_U = 8              # fc_u input width: tiny pad of 4 -> 8 (== full array dim)
_TM = 1024           # max row tile for large node batches
USE_BF16 = False     # optional bf16 matmul inputs (loosen tolerances if used)


def _round_up_pow2(n, minimum=8):
    p = minimum
    while p < n:
        p <<= 1
    return p


def _choose_tiling(n_rows):
    """n_rows is a power of two >= 8; returns (row_tile, grid_steps).
    Buckets > 256 rows always get >= 2 grid steps so megacore sharding on
    v7x has work for both TensorCores."""
    if n_rows <= 256:
        return n_rows, 1
    tm = min(_TM, n_rows // 2)
    assert n_rows % tm == 0, f"bucketed rows {n_rows} not divisible by tile {tm}"
    return tm, n_rows // tm


# ----------------------------- Pallas kernel ---------------------------------
def _linear_relu_kernel(x_ref, w_ref, b_ref, o_ref):
    # o = relu(x @ w + b); f32 accumulation on the MXU.  Serves both the fc_u
    # projection (K=8) and the packed fc_h layer (K=128, W_h blocks stacked
    # along the contraction axis).
    y = jnp.dot(x_ref[...], w_ref[...], preferred_element_type=jnp.float32)
    o_ref[...] = jnp.maximum(y + b_ref[...], 0.0).astype(o_ref.dtype)


# --------------------------- jitted Pallas wrapper ----------------------------
@jax.jit
def _linear_relu(x, w, b):
    """relu(x @ w + b); x is (Np, K) with Np a power-of-two bucket, w (K, 128)."""
    Np, K = x.shape
    x = x.astype(w.dtype)                     # no-op for f32; bf16 if enabled
    tm, nsteps = _choose_tiling(Np)
    act_spec = pl.BlockSpec(
        (tm, K), lambda i: (i, 0),
        pipeline_mode=pl.Buffered(3) if nsteps > 2 else None)
    return pl.pallas_call(
        _linear_relu_kernel,
        out_shape=jax.ShapeDtypeStruct((Np, H_PAD), jnp.float32),
        grid=(nsteps,),
        in_specs=[
            act_spec,                                     # activation tiles
            pl.BlockSpec((K, H_PAD), lambda i: (0, 0)),   # resident weights
            pl.BlockSpec((1, H_PAD), lambda i: (0, 0)),   # bias row
        ],
        out_specs=pl.BlockSpec((tm, H_PAD), lambda i: (i, 0)),
        compiler_params=pltpu.CompilerParams(dimension_semantics=("parallel",)),
    )(x, w, b)


def prepare_params(W_u, b_u, W_h, b_h):
    """Zero-pad weights to lane-dense blocks.  Padding is exact zero, so padded
    lanes contribute nothing and stay zero through the recursion."""
    W_u = jnp.asarray(W_u, jnp.float32)           # (n_hidden, n_features)
    W_h = jnp.asarray(W_h, jnp.float32)           # (n_hidden, 3*n_hidden)
    wu = jnp.zeros((K_U, H_PAD), jnp.float32).at[:N_FEATURES, :N_HIDDEN].set(W_u.T)
    bu = jnp.zeros((1, H_PAD), jnp.float32).at[0, :N_HIDDEN].set(
        jnp.asarray(b_u, jnp.float32))
    # Single stacked fc_h weight: rows 0-31 act on h_L lanes, 32-63 on h_R,
    # 64-95 on u (matching the concat order of the original module).
    wh = jnp.zeros((H_PAD, H_PAD), jnp.float32).at[:3 * N_HIDDEN, :N_HIDDEN].set(W_h.T)
    bh = jnp.zeros((1, H_PAD), jnp.float32).at[0, :N_HIDDEN].set(
        jnp.asarray(b_h, jnp.float32))
    if USE_BF16:
        wu, wh = wu.astype(jnp.bfloat16), wh.astype(jnp.bfloat16)
    return dict(Wu=wu, bu=bu, Wh=wh, bh=bh)


# ------------------------- tree batching (host glue) --------------------------
def batch(jets):
    """Level-wise batching of binary jet trees (same conventions as the
    original RecNN code).  Data-dependent BFS graph glue -> stays in numpy."""
    jet_children = []
    offset = 0
    for jet in jets:
        tree = np.copy(jet["tree"])
        tree[tree != -1] += offset
        jet_children.append(tree)
        offset += len(tree)
    jet_children = np.vstack(jet_children)
    jet_contents = np.vstack([jet["content"] for jet in jets]).astype(np.float32)
    n_nodes = offset

    level_children = np.zeros((n_nodes, 4), dtype=np.int64)
    level_children[:, [0, 2]] -= 1

    inners, outers = [], []
    offset = 0
    for jet in jets:
        queue = [(jet["root_id"] + offset, -1, True, 0)]
        while queue:
            node, parent, is_left, depth = queue.pop(0)
            if len(inners) < depth + 1:
                inners.append([])
            if len(outers) < depth + 1:
                outers.append([])
            if jet_children[node, 0] != -1:          # inner node
                inners[depth].append(node)
                position = len(inners[depth]) - 1
                is_leaf = False
                queue.append((jet_children[node, 0], node, True, depth + 1))
                queue.append((jet_children[node, 1], node, False, depth + 1))
            else:                                    # leaf
                outers[depth].append(node)
                position = len(outers[depth]) - 1
                is_leaf = True
            if parent >= 0:
                if is_left:
                    level_children[parent, 0] = position
                    level_children[parent, 1] = is_leaf
                else:
                    level_children[parent, 2] = position
                    level_children[parent, 3] = is_leaf
        offset += len(jet["tree"])

    levels, n_inners, contents = [], [], []
    prev_inner = np.array([], dtype=np.int64)
    for inner, outer in zip(inners, outers):
        n_inners.append(len(inner))
        inner = np.array(inner, dtype=np.int64)
        outer = np.array(outer, dtype=np.int64)
        levels.append(np.concatenate((inner, outer)))
        left = prev_inner[level_children[prev_inner, 1] == 1]
        level_children[left, 0] += len(inner)
        right = prev_inner[level_children[prev_inner, 3] == 1]
        level_children[right, 2] += len(inner)
        contents.append(jet_contents[levels[-1]])
        prev_inner = levels[-1][:n_inners[-1]]

    return levels, level_children[:, [0, 2]], n_inners, contents


# ------------------------------ RecNN forward ---------------------------------
def recnn_forward_pallas(pparams, jets):
    levels, children, n_inners, contents = batch(jets)
    n_levels = len(levels)

    # ---- fc_u hoisted out of the level loop: one launch for ALL nodes -------
    level_sizes = [len(c) for c in contents]
    offsets = np.concatenate(([0], np.cumsum(level_sizes))).astype(np.int64)
    content_all = np.concatenate(contents, axis=0).astype(np.float32)   # (T, F)
    T = content_all.shape[0]
    Np = _round_up_pow2(T)
    xp = np.zeros((Np, K_U), np.float32)
    xp[:T, :N_FEATURES] = content_all                                   # host pre-pad
    u_all = _linear_relu(jnp.asarray(xp), pparams["Wu"], pparams["bu"])  # (Np, 128)

    # ---- bottom-up recursion over levels -------------------------------------
    # TODO(synk): the whole level recursion could be fused into one persistent
    # pallas_call (VMEM-resident embeddings table + scalar-prefetched per-level
    # offsets/child indices); kept as per-level launches because the
    # data-dependent row gather on a VMEM ref is the remaining risky piece.
    embeddings = []
    for j in range(n_levels - 1, -1, -1):
        lo, hi = int(offsets[j]), int(offsets[j + 1])
        u_k = u_all[lo:hi]                                   # (n_j, 128)
        ni = n_inners[j]
        if ni > 0:
            Nb = _round_up_pow2(ni)
            # Host-side index padding (valid indices) so the XLA gathers below
            # directly yield bucket-sized tiles; padded rows are junk that is
            # sliced off after the kernel -> no _pad_rows copies.
            inner_pad = np.full((Nb,), levels[j][0], np.int64)
            inner_pad[:ni] = levels[j][:ni]
            left_idx = jnp.asarray(children[inner_pad, 0], jnp.int32)
            right_idx = jnp.asarray(children[inner_pad, 1], jnp.int32)
            u_idx = np.full((Nb,), lo, np.int64)
            u_idx[:ni] = np.arange(lo, lo + ni)
            u_idx = jnp.asarray(u_idx, jnp.int32)

            prev = embeddings[-1]
            h_L = prev[left_idx, :N_HIDDEN]                  # (Nb, 32)
            h_R = prev[right_idx, :N_HIDDEN]                 # (Nb, 32)
            u_in = u_all[u_idx, :N_HIDDEN]                   # (Nb, 32)
            # Single lane-dense packed activation tile [hL | hR | u | 0].
            packed = jnp.concatenate(
                (h_L, h_R, u_in,
                 jnp.zeros((Nb, H_PAD - 3 * N_HIDDEN), jnp.float32)), axis=1)
            h = _linear_relu(packed, pparams["Wh"], pparams["bh"])[:ni]
            embeddings.append(jnp.concatenate((h, u_k[ni:]), axis=0))
        else:
            embeddings.append(u_k)

    out = embeddings[-1][:, :N_HIDDEN]            # drop the zero padding lanes
    return out.reshape((len(jets), -1))


def recnn_forward_ref(params, jets):
    """Pure-JAX reference of the original forward (unpadded, un-fused)."""
    levels, children, n_inners, contents = batch(jets)
    n_levels = len(levels)
    children = jnp.asarray(children, jnp.int32)
    act = lambda x, w, b: jnp.maximum(jnp.asarray(x, jnp.float32) @ w.T + b, 0.0)
    embeddings = []
    for j in range(n_levels - 1, -1, -1):
        u_k = act(contents[j], params["W_u"], params["b_u"])
        ni = n_inners[j]
        if ni > 0:
            inner = jnp.asarray(levels[j][:ni], jnp.int32)
            h_L = embeddings[-1][children[inner, 0]]
            h_R = embeddings[-1][children[inner, 1]]
            h = jnp.concatenate((h_L, h_R, u_k[:ni]), axis=1)
            h = act(h, params["W_h"], params["b_h"])
            embeddings.append(jnp.concatenate((h, u_k[ni:]), axis=0))
        else:
            embeddings.append(u_k)
    return embeddings[-1].reshape((len(jets), -1))


# ---------------------------------- main --------------------------------------
if __name__ == "__main__":
    key = jax.random.PRNGKey(0)
    k_wu, k_bu, k_wh, k_bh, k_c1, k_c2 = jax.random.split(key, 6)

    gain = math.sqrt(2.0)  # relu gain
    bound_u = gain * math.sqrt(6.0 / (N_FEATURES + N_HIDDEN))  # xavier_uniform
    W_u = jax.random.uniform(k_wu, (N_HIDDEN, N_FEATURES), jnp.float32,
                             -bound_u, bound_u)
    b_u = jax.random.uniform(k_bu, (N_HIDDEN,), jnp.float32,
                             -1.0 / math.sqrt(N_FEATURES), 1.0 / math.sqrt(N_FEATURES))
    W_h = jax.nn.initializers.orthogonal(scale=gain)(k_wh, (N_HIDDEN, 3 * N_HIDDEN),
                                                     jnp.float32)
    b_h = jax.random.uniform(k_bh, (N_HIDDEN,), jnp.float32,
                             -1.0 / math.sqrt(3 * N_HIDDEN), 1.0 / math.sqrt(3 * N_HIDDEN))
    params = dict(W_u=W_u, b_u=b_u, W_h=W_h, b_h=b_h)
    pparams = prepare_params(W_u, b_u, W_h, b_h)

    # Two small binary jet trees (node -> [left, right], -1 = leaf).
    tree1 = np.array([[1, 2], [3, 4], [5, 6],
                      [-1, -1], [-1, -1], [-1, -1], [-1, -1]], np.int64)
    tree2 = np.array([[1, 2], [3, 4], [-1, -1], [-1, -1], [-1, -1]], np.int64)
    c1 = np.asarray(jax.random.normal(k_c1, (7, N_FEATURES), jnp.float32))
    c2 = np.asarray(jax.random.normal(k_c2, (5, N_FEATURES), jnp.float32))
    jets = [{"tree": tree1, "content": c1, "root_id": 0},
            {"tree": tree2, "content": c2, "root_id": 0}]

    out = recnn_forward_pallas(pparams, jets)
    out = jax.block_until_ready(out)

    ref = jax.block_until_ready(recnn_forward_ref(params, jets))

    assert out.shape == (len(jets), N_HIDDEN)
    np.testing.assert_allclose(np.asarray(out), np.asarray(ref),
                               rtol=1e-5, atol=1e-5)
    print("KERNEL_OK")
</pallas_src>

<mosaic_0001>
module attributes {stable_mosaic.version = 11 : i64} {
  func.func @_linear_relu_kernel(%arg0: i32, %arg1: memref<16x8xf32, #tpu.memory_space<vmem>>, %arg2: memref<8x128xf32, #tpu.memory_space<vmem>>, %arg3: memref<1x128xf32, #tpu.memory_space<vmem>>, %arg4: memref<16x128xf32, #tpu.memory_space<vmem>>) attributes {dimension_semantics = [#tpu.dimension_semantics<parallel>], iteration_bounds = array<i64: 1>, scalar_prefetch = 0 : i64, scratch_operands = 0 : i64, tpu.core_type = #tpu.core_type<tc>, window_params = [{transform_indices = @transform_0, window_bounds = array<i64: 16, 8>}, {pipeline_mode = #tpu.pipeline_mode<synchronous>, transform_indices = @transform_1, window_bounds = array<i64: 8, 128>}, {pipeline_mode = #tpu.pipeline_mode<synchronous>, transform_indices = @transform_2, window_bounds = array<i64: 1, 128>}, {transform_indices = @transform_3, window_bounds = array<i64: 16, 128>}]} {
    %c0 = arith.constant 0 : index
    %c0_0 = arith.constant 0 : index
    %0 = vector.load %arg1[%c0, %c0_0] : memref<16x8xf32, #tpu.memory_space<vmem>>, vector<16x8xf32>
    %c0_1 = arith.constant 0 : index
    %c0_2 = arith.constant 0 : index
    %1 = vector.load %arg2[%c0_1, %c0_2] : memref<8x128xf32, #tpu.memory_space<vmem>>, vector<8x128xf32>
    %cst = arith.constant dense<0.000000e+00> : vector<16x128xf32>
    %2 = tpu.matmul %0, %1, %cst {dimension_numbers = #tpu.dot_dimension_numbers<[1], [0], [0], [1], [0, 0, 1, 1], [], []>} : vector<16x8xf32>, vector<8x128xf32>, vector<16x128xf32> -> vector<16x128xf32>
    %c0_3 = arith.constant 0 : index
    %c0_4 = arith.constant 0 : index
    %3 = vector.load %arg3[%c0_3, %c0_4] : memref<1x128xf32, #tpu.memory_space<vmem>>, vector<1x128xf32>
    %4 = vector.broadcast %3 : vector<1x128xf32> to vector<16x128xf32>
    %5 = arith.addf %2, %4 : vector<16x128xf32>
    %cst_5 = arith.constant 0.000000e+00 : f32
    %6 = vector.broadcast %cst_5 : f32 to vector<16x128xf32>
    %7 = arith.maximumf %5, %6 : vector<16x128xf32>
    %c0_6 = arith.constant 0 : index
    %c0_7 = arith.constant 0 : index
    %8 = vector.load %arg4[%c0_6, %c0_7] : memref<16x128xf32, #tpu.memory_space<vmem>>, vector<16x128xf32>
    tpu.vector_store %arg4[%c0_6, %c0_7], %7 {strides = array<i32>} : memref<16x128xf32, #tpu.memory_space<vmem>>, vector<16x128xf32>,
    return
  }
  func.func @transform_0(%arg0: i32) -> (i32, i32) {
    %c0_i32 = arith.constant 0 : i32
    %c0_i32_0 = arith.constant 0 : i32
    return %arg0, %c0_i32 : i32, i32
  }
  func.func @transform_1(%arg0: i32) -> (i32, i32) {
    %c0_i32 = arith.constant 0 : i32
    %c0_i32_0 = arith.constant 0 : i32
    %c0_i32_1 = arith.constant 0 : i32
    return %c0_i32, %c0_i32_0 : i32, i32
  }
  func.func @transform_2(%arg0: i32) -> (i32, i32) {
    %c0_i32 = arith.constant 0 : i32
    %c0_i32_0 = arith.constant 0 : i32
    %c0_i32_1 = arith.constant 0 : i32
    return %c0_i32, %c0_i32_0 : i32, i32
  }
  func.func @transform_3(%arg0: i32) -> (i32, i32) {
    %c0_i32 = arith.constant 0 : i32
    %c0_i32_0 = arith.constant 0 : i32
    return %arg0, %c0_i32 : i32, i32
  }
}

</mosaic_0001>

<bundles_post_ra>
// kernel: _linear_relu.1
= control target key start
LH: loop header
LB: loop body
LE: loop exit
PB: predicated region body
PF: predicated region fallthrough
CT: control target
= control target key end

     0   :  { %vm25_vm0 = vcmask 64512   ;;  %s212_s0 = inlined_call_operand.vmem [shape: f32[16,8], index: 0, kind: input, shape index: {}]   ;;  %s213_s1 = inlined_call_operand.vmem [shape: f32[8,128], index: 1, kind: input, shape index: {}]   ;;  %s214_s2 = inlined_call_operand.vmem [shape: f32[1,128], index: 2, kind: input, shape index: {}]   ;;  %s215_s3 = inlined_call_operand.hbm [shape: f32[16,128], index: 3, kind: output, shape index: {}]  }
   0x1   :  { %v17_v0 = vld [vmem:[%s213_s1] sm:$0xff]  ;;  %v16_v2 = vld [vmem:[%s212_s0 + $0x8] sm:$0xff] }
   0x2   :  { %v15_v1 = vld [vmem:[%s212_s0] sm:$0xff]  ;;  %133 = vmatprep.subr.mxu0 %v17_v0 }
   0x3   :  { %135 = vmatprep.mubr.msk.f32.mxu0 %vm25_vm0, %v15_v1 }
   0x4   :  { %8 = vsyncpa [#allocation3], 0  ;;  %134 = vmatpush3.msra.mxu0 %v17_v0  ;;  %v127_v3 = vld [vmem:[%s214_s2] ss:$0 sm:$0xff]  ;;  %s165_s1 = smov [#allocation2]  }
   0x5   :  { %136 = vmatmul.mubr.msk.f32.vlgmr.msra.gmra.mrb[0].mxu0 %vm25_vm0, %v16_v2  ;;  %s116_s20 = sshll.u32 %s165_s1, 4  ;;  %s117_s20 = int_to_ptr.vmem [resolvable:$true] %s116_s20 }
   0x6   :  { %s141_s0 = scalar_lea.vmem %s117_s20, 256  ;;  %p146_p1 = scmp.lt.s32.totalorder %s117_s20, %s117_s20 }
   0x7   :  { %p142_p0 = scmp.ne.s32.totalorder %s117_s20, %s141_s0  ;;  %p147_p2 = scmp.lt.s32.totalorder %s141_s0, %s141_s0 }
   0x9   :  { %p148_p3 = por %p147_p2, %p146_p1 }
   0xb   :  { %p149_p4 = pnand %p148_p3, %p142_p0 }
  0xd8   :  { %v137_v4 = vpop.f32.mrb[0].mxu0 }
  0xd9   :  { %v104_v5 = vadd.f32 %v137_v4, %v127_v3  ;;  %v98_v6 = vpop.f32.mrb[1].mxu0 }
  0xda   :  { %v99_v7 = vadd.f32 %v127_v3, %v98_v6 }
  0xdb   :  { %v108_v8 = vmax.f32 %v104_v5, 0.0 }
  0xdc   :  { %v107_v9 = vmax.f32 %v99_v7, 0.0 }
  0xdd   :  { %110 = vst [vmem:[#allocation2 + $0x8] sm:$0xff] %v108_v8 }
  0xde   :  { %109 = vst [vmem:[#allocation2] sm:$0xff] %v107_v9 }
  0xdf   :  { %152 = shalt.err (!%p149_p4)
}
  0xe0   :  { %s153_s22 = scalar_lea.hbm %s215_s3, 256 }
  0xe1   :  { %p154_p5 = scmp.ne.s32.totalorder %s215_s3, %s153_s22  ;;  %p157_p6 = scmp.lt.u32.totalorder %s153_s22, %s215_s3 }
  0xe3   :  { %p159_p7 = pnand %p157_p6, %p154_p5 }
  0xe5   :  { %162 = shalt.err (!%p159_p7)
}
  0xe6   :  { %s166_s27 = smov 128   ;;  %s167_s28 = smov 8  }
  0xe7   :  { %122 = dma.vmem_to_hbm [thread:$0]  %s117_s20, 256, %s215_s3, [#allocation3], %s166_s27, %s166_s27, %s167_s28  }
  0xe8   :  { %163 = dma.done.wait [#allocation3], 256  }
  0xe9   :  { %164 = vsyncadd [#allocation3], 4294967040 }
  0xea   :  { %126 = vsyncpa [#allocation3], 1 }

</bundles_post_ra>
